<compile_context>
chip_gen: v6e
topology: v6e:2x2x1
jax: 0.10.0
libtpu: 0.0.40
codegen_flags: <defaults>
</compile_context>

<pallas_src>
import functools

import jax
import jax.numpy as jnp
from jax import lax
from jax.experimental import pallas as pl
from jax.experimental.pallas import tpu as pltpu


_VMEM_BUDGET = 28 * 1024 * 1024        # double-buffered working-set budget per pass
_VMEM_LIMIT = 40 * 1024 * 1024         # scoped VMEM cap (safe on v5e/v6e/v7x)
_RESIDENT_Z_BYTES = 8 * 1024 * 1024    # keep whole z in VMEM below this size


def _round_up(x: int, m: int) -> int:
    return ((x + m - 1) // m) * m


# --------------------------------------------------------------------------- pass 1
def _prep_kernel(x_ref, w_ref, z_ref, *, nlayers: int):
    """Attentive layers (column scaling, ReLU between layers) + row L2-normalize."""
    x = x_ref[...].astype(jnp.float32)
    w = w_ref[...].astype(jnp.float32)          # (nlayers, D)
    # Keep the interleaved scale/ReLU loop: folding the scalings into one product is
    # only valid for nonnegative weights, which is not guaranteed in general.
    for i in range(nlayers):
        x = x * w[i][None, :]                   # x @ diag(w_i)
        if i != nlayers - 1:
            x = jnp.maximum(x, 0.0)             # activation = ReLU
    # F.normalize(dim=1, p=2, eps=1e-12): clamp sum-of-squares at eps**2, use rsqrt
    # (EUP slot) + a single multiply instead of sqrt + full-tile divide.
    ss = jnp.sum(x * x, axis=1, keepdims=True)
    inv = lax.rsqrt(jnp.maximum(ss, 1e-24))
    z_ref[...] = (x * inv).astype(z_ref.dtype)


# --------------------------------------------------------------------------- pass 2
def _gram_tiled_kernel(zi_ref, zj_ref, out_ref):
    """(tile, tile) tile of relu(z @ z.T); zj streamed from HBM per inner step."""
    sim = lax.dot_general(
        zi_ref[...], zj_ref[...],
        dimension_numbers=(((1,), (1,)), ((), ())),   # no materialized z.T
        preferred_element_type=jnp.float32)
    out_ref[...] = jnp.maximum(sim, 0.0).astype(out_ref.dtype)


def _gram_resident_kernel(zi_ref, zall_ref, out_ref, *, tn: int):
    """(tile, tile) tile of relu(z @ z.T); full z resident in VMEM (loaded once)."""
    off = pl.multiple_of(pl.program_id(1) * tn, 128)
    zj = zall_ref[pl.ds(off, tn), :]
    sim = lax.dot_general(
        zi_ref[...], zj,
        dimension_numbers=(((1,), (1,)), ((), ())),
        preferred_element_type=jnp.float32)
    out_ref[...] = jnp.maximum(sim, 0.0).astype(out_ref.dtype)


# --------------------------------------------------------------------------- tiling
def _pick_gram_tile(n, d_pad, zbytes, obytes):
    """Pick (tile, n_pad, z_resident) for the gram pass: largest square tile whose
    double-buffered working set fits the VMEM budget and whose row padding <=12.5%."""
    n128 = _round_up(n, 128)
    fallback = (128, n128, n128 * d_pad * zbytes <= _RESIDENT_Z_BYTES)
    for cand in (1024, 768, 512, 384, 256):
        if cand > n128:
            continue
        n_cand = _round_up(n, cand)
        if (n_cand - n128) * 8 > n128:          # >12.5% wasted rows: skip this tile
            continue
        resident = n_cand * d_pad * zbytes <= _RESIDENT_Z_BYTES
        zj_bytes = (2 * n_cand * d_pad * zbytes if resident
                    else 2 * cand * d_pad * zbytes)
        need = 2 * cand * d_pad * zbytes + zj_bytes + 2 * cand * cand * obytes
        if need <= _VMEM_BUDGET:
            return cand, n_cand, resident
    return fallback


def _pick_row_tile(n_pad, d_pad, nlayers, zbytes):
    """Largest pass-1 row tile that divides n_pad and fits the VMEM budget."""
    for cand in (1024, 768, 512, 384, 256, 128):
        if cand > n_pad or n_pad % cand:
            continue
        need = (2 * cand * d_pad * 4          # x tile (f32), double-buffered
                + 2 * nlayers * d_pad * 4     # weights (constant block), conservative
                + 2 * cand * d_pad * zbytes)  # z tile out, double-buffered
        if need <= _VMEM_BUDGET:
            return cand
    return 128


# --------------------------------------------------------------------------- wrapper
def att_learner_forward(features: jax.Array, weights: jax.Array, *,
                        matmul_dtype=jnp.bfloat16, out_dtype=jnp.float32):
    """features: (N, D), weights: (nlayers, D) -> relu(cosine similarity), (N, N).

    matmul_dtype: dtype of z fed to the MXU (bf16 default; f32 accumulation).
    out_dtype:    dtype of the similarity matrix. f32 matches the module exactly;
                  bf16 halves the dominant n^2 writeback when D is small (the
                  diagonal is then no longer exactly 1.0).
    """
    n, d = features.shape
    nlayers, dw = weights.shape
    assert dw == d, "weight size must match feature size"

    zbytes = jnp.dtype(matmul_dtype).itemsize
    obytes = jnp.dtype(out_dtype).itemsize

    # Pad D: 256-multiples fill the v6e/v7x 2x256^2 MXU when compute-bound; tiny D
    # stays at 128 (that regime is output-writeback bound, so don't double its work).
    d_pad = 128 if d <= 128 else _round_up(d, 256)

    tile, n_pad, z_resident = _pick_gram_tile(n, d_pad, zbytes, obytes)
    row_tile = _pick_row_tile(n_pad, d_pad, nlayers, zbytes)

    x = jnp.pad(features.astype(jnp.float32), ((0, n_pad - n), (0, d_pad - d)))
    w = jnp.pad(weights.astype(jnp.float32), ((0, 0), (0, d_pad - d)))

    cparams = dict(vmem_limit_bytes=_VMEM_LIMIT)

    # ---- Pass 1: per-row preprocessing (scaling layers + L2 normalize), row-tiled.
    # Pure streaming -> large row tiles (per-grid-step overhead ~0.35us otherwise).
    z = pl.pallas_call(
        functools.partial(_prep_kernel, nlayers=nlayers),
        out_shape=jax.ShapeDtypeStruct((n_pad, d_pad), matmul_dtype),
        grid=(n_pad // row_tile,),
        in_specs=[
            pl.BlockSpec((row_tile, d_pad), lambda i: (i, 0)),
            pl.BlockSpec((nlayers, d_pad), lambda i: (0, 0)),
        ],
        out_specs=pl.BlockSpec((row_tile, d_pad), lambda i: (i, 0)),
        compiler_params=pltpu.CompilerParams(
            dimension_semantics=("parallel",), **cparams),
    )(x, w)

    # ---- Pass 2: tiled Gram matrix relu(z @ z.T), 2-D (i, j) output grid of
    # lane-dense (tile, tile) tiles; both axes "parallel" (v7x megacore split).
    flops = 2 * n_pad * n_pad * d_pad
    if z_resident:
        bytes_accessed = 2 * n_pad * d_pad * zbytes + n_pad * n_pad * obytes
    else:
        bytes_accessed = (n_pad * d_pad * zbytes
                          + (n_pad // tile) * n_pad * d_pad * zbytes
                          + n_pad * n_pad * obytes)
    cost = pl.CostEstimate(flops=flops, transcendentals=0,
                           bytes_accessed=bytes_accessed)

    if z_resident:
        # Whole z lives in VMEM (constant (0,0) block -> DMA'd from HBM once);
        # eliminates the (n_pad/tile)x re-read that dominated input traffic.
        gram = pl.pallas_call(
            functools.partial(_gram_resident_kernel, tn=tile),
            out_shape=jax.ShapeDtypeStruct((n_pad, n_pad), out_dtype),
            grid=(n_pad // tile, n_pad // tile),
            in_specs=[
                pl.BlockSpec((tile, d_pad), lambda i, j: (i, 0)),
                pl.BlockSpec((n_pad, d_pad), lambda i, j: (0, 0)),
            ],
            out_specs=pl.BlockSpec((tile, tile), lambda i, j: (i, j)),
            compiler_params=pltpu.CompilerParams(
                dimension_semantics=("parallel", "parallel"), **cparams),
            cost_estimate=cost,
        )
    else:
        # z too big for VMEM: stream zj row tiles; tile size was chosen large enough
        # that the streamed-operand intensity (= tile FLOP/byte) clears the compute
        # roofline on v6e/v7x.
        gram = pl.pallas_call(
            _gram_tiled_kernel,
            out_shape=jax.ShapeDtypeStruct((n_pad, n_pad), out_dtype),
            grid=(n_pad // tile, n_pad // tile),
            in_specs=[
                pl.BlockSpec((tile, d_pad), lambda i, j: (i, 0)),
                pl.BlockSpec((tile, d_pad), lambda i, j: (j, 0)),
            ],
            out_specs=pl.BlockSpec((tile, tile), lambda i, j: (i, j)),
            compiler_params=pltpu.CompilerParams(
                dimension_semantics=("parallel", "parallel"), **cparams),
            cost_estimate=cost,
        )

    sim = gram(z, z)
    return sim[:n, :n]


# --------------------------------------------------------------------------- reference
def att_learner_reference(features, weights):
    """Plain-JAX reference matching the PyTorch forward (f32 throughout)."""
    x = features.astype(jnp.float32)
    nlayers = weights.shape[0]
    for i in range(nlayers):
        x = x * weights[i][None, :]
        if i != nlayers - 1:
            x = jnp.maximum(x, 0.0)
    norm = jnp.sqrt(jnp.sum(x * x, axis=1, keepdims=True))
    z = x / jnp.maximum(norm, 1e-12)
    sim = z @ z.T
    return jnp.maximum(sim, 0.0)


if __name__ == "__main__":
    # Small shapes consistent with the module: N nodes, feature size D, nlayers layers.
    N, D, NLAYERS = 16, 32, 3

    key = jax.random.PRNGKey(0)
    k_feat, k_w, k_f2, k_w2 = jax.random.split(key, 4)
    features = jax.random.normal(k_feat, (N, D), dtype=jnp.float32)
    weights = jax.random.uniform(k_w, (NLAYERS, D), dtype=jnp.float32)  # torch.rand-like

    ref = att_learner_reference(features, weights)

    # f32-operand matmul path: tight check against the PyTorch-equivalent reference.
    fwd_f32 = jax.jit(functools.partial(att_learner_forward, matmul_dtype=jnp.float32))
    out_f32 = jax.block_until_ready(fwd_f32(features, weights))
    assert out_f32.shape == (N, N)
    assert jnp.allclose(out_f32, ref, atol=1e-4, rtol=1e-4), "f32 mismatch vs reference"

    # bf16-operand matmul (f32 accumulation): fast MXU path; looser tolerance.
    fwd_bf16 = jax.jit(functools.partial(att_learner_forward, matmul_dtype=jnp.bfloat16))
    out_bf16 = jax.block_until_ready(fwd_bf16(features, weights))
    assert out_bf16.shape == (N, N)
    assert jnp.allclose(out_bf16, ref, atol=2e-2, rtol=2e-2), "bf16 mismatch vs reference"

    # Exercise non-128 N / D padding and a larger gram tile (still small & resident).
    N2, D2 = 200, 160
    f2 = jax.random.normal(k_f2, (N2, D2), dtype=jnp.float32)
    w2 = jax.random.uniform(k_w2, (NLAYERS, D2), dtype=jnp.float32)
    ref2 = att_learner_reference(f2, w2)
    out2 = jax.block_until_ready(
        jax.jit(functools.partial(att_learner_forward, matmul_dtype=jnp.float32))(f2, w2))
    assert out2.shape == (N2, N2)
    assert jnp.allclose(out2, ref2, atol=1e-4, rtol=1e-4), "padded-shape mismatch"

    print("KERNEL_OK")
</pallas_src>

<mosaic_0001>
module attributes {stable_mosaic.version = 11 : i64} {
  func.func @_gram_resident_kernel(%arg0: i32, %arg1: i32, %arg2: memref<128x128xf32, #tpu.memory_space<vmem>>, %arg3: memref<128x128xf32, #tpu.memory_space<vmem>>, %arg4: memref<128x128xf32, #tpu.memory_space<vmem>>) attributes {dimension_semantics = [#tpu.dimension_semantics<parallel>, #tpu.dimension_semantics<parallel>], iteration_bounds = array<i64: 1, 1>, scalar_prefetch = 0 : i64, scratch_operands = 0 : i64, tpu.core_type = #tpu.core_type<tc>, window_params = [{transform_indices = @transform_0, window_bounds = array<i64: 128, 128>}, {pipeline_mode = #tpu.pipeline_mode<synchronous>, transform_indices = @transform_1, window_bounds = array<i64: 128, 128>}, {transform_indices = @transform_2, window_bounds = array<i64: 128, 128>}]} {
    %c128_i32 = arith.constant 128 : i32
    %0 = arith.muli %arg1, %c128_i32 : i32
    %1 = tpu.assume_multiple %0, 128 : i32
    %2 = arith.index_cast %1 : i32 to index
    %c0 = arith.constant 0 : index
    %3 = vector.load %arg3[%2, %c0] : memref<128x128xf32, #tpu.memory_space<vmem>>, vector<128x128xf32>
    %c0_0 = arith.constant 0 : index
    %c0_1 = arith.constant 0 : index
    %4 = vector.load %arg2[%c0_0, %c0_1] : memref<128x128xf32, #tpu.memory_space<vmem>>, vector<128x128xf32>
    %cst = arith.constant dense<0.000000e+00> : vector<128x128xf32>
    %5 = tpu.matmul %4, %3, %cst {dimension_numbers = #tpu.dot_dimension_numbers<[1], [1], [0], [0], [0, 0, 1, 0], [], []>} : vector<128x128xf32>, vector<128x128xf32>, vector<128x128xf32> -> vector<128x128xf32>
    %cst_2 = arith.constant 0.000000e+00 : f32
    %6 = vector.broadcast %cst_2 : f32 to vector<128x128xf32>
    %7 = arith.maximumf %5, %6 : vector<128x128xf32>
    %c0_3 = arith.constant 0 : index
    %c0_4 = arith.constant 0 : index
    %8 = vector.load %arg4[%c0_3, %c0_4] : memref<128x128xf32, #tpu.memory_space<vmem>>, vector<128x128xf32>
    tpu.vector_store %arg4[%c0_3, %c0_4], %7 {strides = array<i32>} : memref<128x128xf32, #tpu.memory_space<vmem>>, vector<128x128xf32>,
    return
  }
  func.func @transform_0(%arg0: i32, %arg1: i32) -> (i32, i32) {
    %c0_i32 = arith.constant 0 : i32
    %c0_i32_0 = arith.constant 0 : i32
    return %arg0, %c0_i32 : i32, i32
  }
  func.func @transform_1(%arg0: i32, %arg1: i32) -> (i32, i32) {
    %c0_i32 = arith.constant 0 : i32
    %c0_i32_0 = arith.constant 0 : i32
    %c0_i32_1 = arith.constant 0 : i32
    return %c0_i32, %c0_i32_0 : i32, i32
  }
  func.func @transform_2(%arg0: i32, %arg1: i32) -> (i32, i32) {
    %c0_i32 = arith.constant 0 : i32
    return %arg0, %arg1 : i32, i32
  }
}

module attributes {stable_mosaic.version = 11 : i64} {
  func.func @_prep_kernel(%arg0: i32, %arg1: memref<128x128xf32, #tpu.memory_space<vmem>>, %arg2: memref<3x128xf32, #tpu.memory_space<vmem>>, %arg3: memref<128x128xf32, #tpu.memory_space<vmem>>) attributes {dimension_semantics = [#tpu.dimension_semantics<parallel>], iteration_bounds = array<i64: 1>, scalar_prefetch = 0 : i64, scratch_operands = 0 : i64, tpu.core_type = #tpu.core_type<tc>, window_params = [{transform_indices = @transform_0, window_bounds = array<i64: 128, 128>}, {pipeline_mode = #tpu.pipeline_mode<synchronous>, transform_indices = @transform_1, window_bounds = array<i64: 3, 128>}, {transform_indices = @transform_2, window_bounds = array<i64: 128, 128>}]} {
    %c0 = arith.constant 0 : index
    %c0_0 = arith.constant 0 : index
    %0 = vector.load %arg1[%c0, %c0_0] : memref<128x128xf32, #tpu.memory_space<vmem>>, vector<128x128xf32>
    %c0_1 = arith.constant 0 : index
    %c0_2 = arith.constant 0 : index
    %1 = vector.load %arg2[%c0_1, %c0_2] : memref<3x128xf32, #tpu.memory_space<vmem>>, vector<3x128xf32>
    %2 = vector.extract_strided_slice %1 {offsets = [0, 0], sizes = [1, 128], strides = [1, 1]} : vector<3x128xf32> to vector<1x128xf32>
    %3 = vector.shape_cast %2 : vector<1x128xf32> to vector<128xf32>
    %4 = vector.shape_cast %3 : vector<128xf32> to vector<1x128xf32>
    %5 = vector.broadcast %4 : vector<1x128xf32> to vector<128x128xf32>
    %6 = arith.mulf %0, %5 : vector<128x128xf32>
    %cst = arith.constant 0.000000e+00 : f32
    %7 = vector.broadcast %cst : f32 to vector<128x128xf32>
    %8 = arith.maximumf %6, %7 : vector<128x128xf32>
    %9 = vector.extract_strided_slice %1 {offsets = [1, 0], sizes = [1, 128], strides = [1, 1]} : vector<3x128xf32> to vector<1x128xf32>
    %10 = vector.shape_cast %9 : vector<1x128xf32> to vector<128xf32>
    %11 = vector.shape_cast %10 : vector<128xf32> to vector<1x128xf32>
    %12 = vector.broadcast %11 : vector<1x128xf32> to vector<128x128xf32>
    %13 = arith.mulf %8, %12 : vector<128x128xf32>
    %cst_3 = arith.constant 0.000000e+00 : f32
    %14 = vector.broadcast %cst_3 : f32 to vector<128x128xf32>
    %15 = arith.maximumf %13, %14 : vector<128x128xf32>
    %16 = vector.extract_strided_slice %1 {offsets = [2, 0], sizes = [1, 128], strides = [1, 1]} : vector<3x128xf32> to vector<1x128xf32>
    %17 = vector.shape_cast %16 : vector<1x128xf32> to vector<128xf32>
    %18 = vector.shape_cast %17 : vector<128xf32> to vector<1x128xf32>
    %19 = vector.broadcast %18 : vector<1x128xf32> to vector<128x128xf32>
    %20 = arith.mulf %15, %19 : vector<128x128xf32>
    %21 = arith.mulf %20, %20 : vector<128x128xf32>
    %cst_4 = arith.constant dense<0.000000e+00> : vector<128xf32>
    %22 = vector.multi_reduction <add>, %21, %cst_4 [1] : vector<128x128xf32> to vector<128xf32>
    %23 = vector.shape_cast %22 : vector<128xf32> to vector<128x1xf32>
    %cst_5 = arith.constant 1.000000e-24 : f32
    %24 = vector.broadcast %cst_5 : f32 to vector<128x1xf32>
    %25 = arith.maximumf %23, %24 : vector<128x1xf32>
    %26 = math.rsqrt %25 : vector<128x1xf32>
    %27 = vector.broadcast %26 : vector<128x1xf32> to vector<128x128xf32>
    %28 = arith.mulf %20, %27 : vector<128x128xf32>
    %c0_6 = arith.constant 0 : index
    %c0_7 = arith.constant 0 : index
    %29 = vector.load %arg3[%c0_6, %c0_7] : memref<128x128xf32, #tpu.memory_space<vmem>>, vector<128x128xf32>
    tpu.vector_store %arg3[%c0_6, %c0_7], %28 {strides = array<i32>} : memref<128x128xf32, #tpu.memory_space<vmem>>, vector<128x128xf32>,
    return
  }
  func.func @transform_0(%arg0: i32) -> (i32, i32) {
    %c0_i32 = arith.constant 0 : i32
    %c0_i32_0 = arith.constant 0 : i32
    return %arg0, %c0_i32 : i32, i32
  }
  func.func @transform_1(%arg0: i32) -> (i32, i32) {
    %c0_i32 = arith.constant 0 : i32
    %c0_i32_0 = arith.constant 0 : i32
    %c0_i32_1 = arith.constant 0 : i32
    return %c0_i32, %c0_i32_0 : i32, i32
  }
  func.func @transform_2(%arg0: i32) -> (i32, i32) {
    %c0_i32 = arith.constant 0 : i32
    %c0_i32_0 = arith.constant 0 : i32
    return %arg0, %c0_i32 : i32, i32
  }
}

</mosaic_0001>

<bundles_post_ra>
// kernel: att_learner_forward.3
= control target key start
LH: loop header
LB: loop body
LE: loop exit
PB: predicated region body
PF: predicated region fallthrough
CT: control target
= control target key end

     0   :  { %s505_s1 = inlined_call_operand.vmem [shape: f32[128,128], index: 1, kind: input, shape index: {}, may-alias: {0,1}]   ;;  %s506_s0 = inlined_call_operand.vmem [shape: f32[128,128], index: 0, kind: input, shape index: {}, may-alias: {0,1}]   ;;  %s507_s2 = inlined_call_operand.vmem [shape: f32[128,128], index: 2, kind: output, shape index: {}]  }
   0x1   :  { %v28_v0 = vld [vmem:[%s505_s1 + $0x78] sm:$0xff]  ;;  %v27_v1 = vld [vmem:[%s505_s1 + $0x70] sm:$0xff]  ;;  %v26_v2 = vld [vmem:[%s505_s1 + $0x68] sm:$0xff] }
   0x2   :  { %258 = vmatprep.subr.mxu0 %v28_v0  ;;  %314 = vmatprep.subr.mxu1 %v28_v0  ;;  %v29_v3 = vld [vmem:[%s506_s0] sm:$0xff]  ;;  %v24_v6 = vld [vmem:[%s505_s1 + $0x58] sm:$0xff]  ;;  %v23_v7 = vld [vmem:[%s505_s1 + $0x50] sm:$0xff] }
   0x3   :  { %259 = vmatpush3.xpose.msra.mxu0 %v28_v0  ;;  %330 = vmatpush3.xpose.msra.mxu1 %v28_v0  ;;  %v37_v4 = vld [vmem:[%s506_s0 + $0x40] sm:$0xff]  ;;  %v22_v8 = vld [vmem:[%s505_s1 + $0x48] sm:$0xff]  ;;  %v20_v10 = vld [vmem:[%s505_s1 + $0x38] sm:$0xff] }
   0x4   :  { %260 = vmatprep.subr.mxu0 %v27_v1  ;;  %315 = vmatprep.subr.mxu1 %v27_v1  ;;  %v25_v5 = vld [vmem:[%s505_s1 + $0x60] sm:$0xff]  ;;  %v19_v11 = vld [vmem:[%s505_s1 + $0x30] sm:$0xff]  ;;  %v18_v12 = vld [vmem:[%s505_s1 + $0x28] sm:$0xff] }
   0x5   :  { %290 = vmatprep.mubr.f32.mxu0 %v29_v3  ;;  %302 = vmatprep.mubr.f32.mxu1 %v37_v4  ;;  %v21_v9 = vld [vmem:[%s505_s1 + $0x40] sm:$0xff]  ;;  %v16_v14 = vld [vmem:[%s505_s1 + $0x18] sm:$0xff]  ;;  %v15_v15 = vld [vmem:[%s505_s1 + $0x10] sm:$0xff] }
   0x6   :  { %v17_v13 = vld [vmem:[%s505_s1 + $0x20] sm:$0xff]  ;;  %v14_v16 = vld [vmem:[%s505_s1 + $0x8] sm:$0xff]  ;;  %v31_v20 = vld [vmem:[%s506_s0 + $0x10] sm:$0xff] }
   0x7   :  { %261 = vmatpush3.xpose.msra.mxu0 %v27_v1  ;;  %331 = vmatpush3.xpose.msra.mxu1 %v27_v1  ;;  %v13_v17 = vld [vmem:[%s505_s1] sm:$0xff]  ;;  %v30_v18 = vld [vmem:[%s506_s0 + $0x8] sm:$0xff]  ;;  %v39_v21 = vld [vmem:[%s506_s0 + $0x50] sm:$0xff] }
   0x8   :  { %262 = vmatprep.subr.mxu0 %v26_v2  ;;  %316 = vmatprep.subr.mxu1 %v26_v2  ;;  %v38_v19 = vld [vmem:[%s506_s0 + $0x48] sm:$0xff]  ;;  %v32_v22 = vld [vmem:[%s506_s0 + $0x18] sm:$0xff]  ;;  %v33_v24 = vld [vmem:[%s506_s0 + $0x20] sm:$0xff] }
   0x9   :  { %v40_v23 = vld [vmem:[%s506_s0 + $0x58] sm:$0xff]  ;;  %v41_v25 = vld [vmem:[%s506_s0 + $0x60] sm:$0xff]  ;;  %v34_v26 = vld [vmem:[%s506_s0 + $0x28] sm:$0xff] }
   0xa   :  { %v42_v27 = vld [vmem:[%s506_s0 + $0x68] sm:$0xff]  ;;  %v35_v28 = vld [vmem:[%s506_s0 + $0x30] sm:$0xff]  ;;  %v36_v30 = vld [vmem:[%s506_s0 + $0x38] sm:$0xff] }
   0xb   :  { %263 = vmatpush3.xpose.msra.mxu0 %v26_v2  ;;  %332 = vmatpush3.xpose.msra.mxu1 %v26_v2  ;;  %v43_v29 = vld [vmem:[%s506_s0 + $0x70] sm:$0xff]  ;;  %v44_v31 = vld [vmem:[%s506_s0 + $0x78] sm:$0xff] }
   0xc   :  { %264 = vmatprep.subr.mxu0 %v25_v5  ;;  %317 = vmatprep.subr.mxu1 %v25_v5 }
   0xf   :  { %265 = vmatpush3.xpose.msra.mxu0 %v25_v5  ;;  %333 = vmatpush3.xpose.msra.mxu1 %v25_v5 }
  0x10   :  { %266 = vmatprep.subr.mxu0 %v24_v6  ;;  %318 = vmatprep.subr.mxu1 %v24_v6 }
  0x13   :  { %267 = vmatpush3.xpose.msra.mxu0 %v24_v6  ;;  %334 = vmatpush3.xpose.msra.mxu1 %v24_v6 }
  0x14   :  { %268 = vmatprep.subr.mxu0 %v23_v7  ;;  %319 = vmatprep.subr.mxu1 %v23_v7 }
  0x17   :  { %269 = vmatpush3.xpose.msra.mxu0 %v23_v7  ;;  %335 = vmatpush3.xpose.msra.mxu1 %v23_v7 }
  0x18   :  { %270 = vmatprep.subr.mxu0 %v22_v8  ;;  %320 = vmatprep.subr.mxu1 %v22_v8 }
  0x1b   :  { %271 = vmatpush3.xpose.msra.mxu0 %v22_v8  ;;  %336 = vmatpush3.xpose.msra.mxu1 %v22_v8 }
  0x1c   :  { %272 = vmatprep.subr.mxu0 %v21_v9  ;;  %321 = vmatprep.subr.mxu1 %v21_v9 }
  0x1f   :  { %273 = vmatpush3.xpose.msra.mxu0 %v21_v9  ;;  %337 = vmatpush3.xpose.msra.mxu1 %v21_v9 }
  0x20   :  { %274 = vmatprep.subr.mxu0 %v20_v10  ;;  %322 = vmatprep.subr.mxu1 %v20_v10 }
  0x23   :  { %275 = vmatpush3.xpose.msra.mxu0 %v20_v10  ;;  %338 = vmatpush3.xpose.msra.mxu1 %v20_v10 }
  0x24   :  { %276 = vmatprep.subr.mxu0 %v19_v11  ;;  %323 = vmatprep.subr.mxu1 %v19_v11 }
  0x27   :  { %277 = vmatpush3.xpose.msra.mxu0 %v19_v11  ;;  %339 = vmatpush3.xpose.msra.mxu1 %v19_v11 }
  0x28   :  { %278 = vmatprep.subr.mxu0 %v18_v12  ;;  %324 = vmatprep.subr.mxu1 %v18_v12 }
  0x2b   :  { %279 = vmatpush3.xpose.msra.mxu0 %v18_v12  ;;  %340 = vmatpush3.xpose.msra.mxu1 %v18_v12 }
  0x2c   :  { %280 = vmatprep.subr.mxu0 %v17_v13  ;;  %325 = vmatprep.subr.mxu1 %v17_v13 }
  0x2f   :  { %281 = vmatpush3.xpose.msra.mxu0 %v17_v13  ;;  %341 = vmatpush3.xpose.msra.mxu1 %v17_v13 }
  0x30   :  { %282 = vmatprep.subr.mxu0 %v16_v14  ;;  %326 = vmatprep.subr.mxu1 %v16_v14 }
  0x33   :  { %283 = vmatpush3.xpose.msra.mxu0 %v16_v14  ;;  %342 = vmatpush3.xpose.msra.mxu1 %v16_v14 }
  0x34   :  { %284 = vmatprep.subr.mxu0 %v15_v15  ;;  %327 = vmatprep.subr.mxu1 %v15_v15 }
  0x37   :  { %285 = vmatpush3.xpose.msra.mxu0 %v15_v15  ;;  %343 = vmatpush3.xpose.msra.mxu1 %v15_v15 }
  0x38   :  { %286 = vmatprep.subr.mxu0 %v14_v16  ;;  %328 = vmatprep.subr.mxu1 %v14_v16 }
  0x3b   :  { %287 = vmatpush3.xpose.msra.mxu0 %v14_v16  ;;  %344 = vmatpush3.xpose.msra.mxu1 %v14_v16 }
  0x3c   :  { %288 = vmatprep.subr.mxu0 %v13_v17  ;;  %329 = vmatprep.subr.mxu1 %v13_v17 }
  0x3f   :  { %289 = vmatpush3.xpose.msra.mxu0 %v13_v17  ;;  %345 = vmatpush3.xpose.msra.mxu1 %v13_v17 }
  0x42   :  { %291 = vmatmul.mubr.f32.vlgmr.msra.gmra.mxu0 %v30_v18  ;;  %303 = vmatmul.mubr.f32.vlgmr.msra.gmra.mxu1 %v38_v19 }
  0x43   :  { %293 = vmatprep.mubr.f32.mxu0 %v31_v20  ;;  %305 = vmatprep.mubr.f32.mxu1 %v39_v21 }
  0x46   :  { %294 = vmatmul.mubr.f32.gmra.mxu0 %v32_v22  ;;  %306 = vmatmul.mubr.f32.gmra.mxu1 %v40_v23 }
  0x47   :  { %296 = vmatprep.mubr.f32.mxu0 %v33_v24  ;;  %308 = vmatprep.mubr.f32.mxu1 %v41_v25 }
  0x4a   :  { %297 = vmatmul.mubr.f32.gmra.mxu0 %v34_v26  ;;  %309 = vmatmul.mubr.f32.gmra.mxu1 %v42_v27 }
  0x4b   :  { %299 = vmatprep.mubr.f32.mxu0 %v35_v28  ;;  %311 = vmatprep.mubr.f32.mxu1 %v43_v29 }
  0x4e   :  { %300 = vmatmul.mubr.f32.gmra.mxu0 %v36_v30  ;;  %312 = vmatmul.mubr.f32.gmra.mxu1 %v44_v31 }
 0x102   :  { %v292_v32 = vpop.f32.mrf.mxu0  ;;  %v304_v33 = vpop.f32.mrf.mxu1 }
 0x103   :  { %v191_v34 = vmax.f32 %v292_v32, 0.0  ;;  %v199_v35 = vmax.f32 %v304_v33, 0.0 }
 0x104   :  { %v111_v36 = vpop.f32.mrf.mxu0  ;;  %v151_v37 = vpop.f32.mrf.mxu1 }
 0x105   :  { %207 = vst [vmem:[%s507_s2 + $0x8] sm:$0xff] %v191_v34  ;;  %215 = vst [vmem:[%s507_s2 + $0x48] sm:$0xff] %v199_v35  ;;  %v190_v38 = vmax.f32 %v111_v36, 0.0  ;;  %v198_v39 = vmax.f32 %v151_v37, 0.0 }
 0x106   :  { %v295_v40 = vpop.f32.mrf.mxu0  ;;  %v307_v41 = vpop.f32.mrf.mxu1 }
 0x107   :  { %206 = vst [vmem:[%s507_s2] sm:$0xff] %v190_v38  ;;  %214 = vst [vmem:[%s507_s2 + $0x40] sm:$0xff] %v198_v39  ;;  %v193_v42 = vmax.f32 %v295_v40, 0.0  ;;  %v201_v43 = vmax.f32 %v307_v41, 0.0 }
 0x108   :  { %v121_v44 = vpop.f32.mrf.mxu0  ;;  %v161_v45 = vpop.f32.mrf.mxu1 }
 0x109   :  { %209 = vst [vmem:[%s507_s2 + $0x18] sm:$0xff] %v193_v42  ;;  %217 = vst [vmem:[%s507_s2 + $0x58] sm:$0xff] %v201_v43  ;;  %v192_v46 = vmax.f32 %v121_v44, 0.0  ;;  %v200_v47 = vmax.f32 %v161_v45, 0.0 }
 0x10a   :  { %v298_v48 = vpop.f32.mrf.mxu0  ;;  %v310_v49 = vpop.f32.mrf.mxu1 }
 0x10b   :  { %208 = vst [vmem:[%s507_s2 + $0x10] sm:$0xff] %v192_v46  ;;  %216 = vst [vmem:[%s507_s2 + $0x50] sm:$0xff] %v200_v47  ;;  %v195_v50 = vmax.f32 %v298_v48, 0.0  ;;  %v203_v51 = vmax.f32 %v310_v49, 0.0 }
 0x10c   :  { %v131_v52 = vpop.f32.mrf.mxu0  ;;  %v171_v53 = vpop.f32.mrf.mxu1 }
 0x10d   :  { %211 = vst [vmem:[%s507_s2 + $0x28] sm:$0xff] %v195_v50  ;;  %219 = vst [vmem:[%s507_s2 + $0x68] sm:$0xff] %v203_v51  ;;  %v194_v54 = vmax.f32 %v131_v52, 0.0  ;;  %v202_v55 = vmax.f32 %v171_v53, 0.0 }
 0x10e   :  { %v301_v56 = vpop.f32.mrf.mxu0  ;;  %v313_v57 = vpop.f32.mrf.mxu1 }
 0x10f   :  { %210 = vst [vmem:[%s507_s2 + $0x20] sm:$0xff] %v194_v54  ;;  %218 = vst [vmem:[%s507_s2 + $0x60] sm:$0xff] %v202_v55  ;;  %v197_v58 = vmax.f32 %v301_v56, 0.0  ;;  %v205_v59 = vmax.f32 %v313_v57, 0.0 }
 0x110   :  { %v141_v60 = vpop.f32.mrf.mxu0  ;;  %v181_v61 = vpop.f32.mrf.mxu1 }
 0x111   :  { %213 = vst [vmem:[%s507_s2 + $0x38] sm:$0xff] %v197_v58  ;;  %221 = vst [vmem:[%s507_s2 + $0x78] sm:$0xff] %v205_v59  ;;  %v196_v62 = vmax.f32 %v141_v60, 0.0  ;;  %v204_v63 = vmax.f32 %v181_v61, 0.0 }
 0x113   :  { %212 = vst [vmem:[%s507_s2 + $0x30] sm:$0xff] %v196_v62  ;;  %220 = vst [vmem:[%s507_s2 + $0x70] sm:$0xff] %v204_v63 }

// kernel: att_learner_forward.2
= control target key start
LH: loop header
LB: loop body
LE: loop exit
PB: predicated region body
PF: predicated region fallthrough
CT: control target
= control target key end

     0   :  { %v28_v0 = vlaneseq  ;;  %s516_s1 = inlined_call_operand.vmem [shape: f32[3,128], index: 1, kind: input, shape index: {}]   ;;  %s517_s0 = inlined_call_operand.vmem [shape: f32[128,128], index: 0, kind: input, shape index: {}]   ;;  %s518_s2 = inlined_call_operand.vmem [shape: f32[128,128], index: 2, kind: output, shape index: {}]  }
   0x1   :  { %v27_v2 = vld [vmem:[%s516_s1] sm:$0x7]  ;;  %v13_v3 = vld [vmem:[%s517_s0 + $0x10] sm:$0xff]  ;;  %v14_v8 = vld [vmem:[%s517_s0 + $0x18] sm:$0xff] }
   0x2   :  { %v29_v1 = vshrl.u32 %v28_v0, 7  ;;  %v11_v7 = vld [vmem:[%s517_s0] sm:$0xff]  ;;  %v12_v9 = vld [vmem:[%s517_s0 + $0x8] sm:$0xff]  ;;  %v18_v13 = vld [vmem:[%s517_s0 + $0x38] sm:$0xff] }
   0x3   :  { %v16_v10 = vld [vmem:[%s517_s0 + $0x28] sm:$0xff]  ;;  %v15_v12 = vld [vmem:[%s517_s0 + $0x20] sm:$0xff]  ;;  %v17_v14 = vld [vmem:[%s517_s0 + $0x30] sm:$0xff] }
   0x4   :  { %v30_v4 = vsub.s32 0, %v29_v1  ;;  %v66_v5 = vsub.s32 1, %v29_v1  ;;  %v102_v6 = vsub.s32 2, %v29_v1  ;;  %v20_v54 = vld [vmem:[%s517_s0 + $0x48] sm:$0xff]  ;;  %v19_v55 = vld [vmem:[%s517_s0 + $0x40] sm:$0xff]  ;;  %v22_v56 = vld [vmem:[%s517_s0 + $0x58] sm:$0xff] }
   0x5   :  { %v21_v60 = vld [vmem:[%s517_s0 + $0x50] sm:$0xff]  ;;  %v24_v61 = vld [vmem:[%s517_s0 + $0x68] sm:$0xff]  ;;  %v23_v62 = vld [vmem:[%s517_s0 + $0x60] sm:$0xff] }
   0x6   :  { %v301_v11 = vrot.slane %v27_v2, %v30_v4  ;;  %v312_v15 = vrot.slane %v27_v2, %v66_v5  ;;  %v314_v16 = vrot.slane %v27_v2, %v102_v6  ;;  %v26_v6 = vld [vmem:[%s517_s0 + $0x78] sm:$0xff] }
   0x8   :  { %v34_v17 = vmul.f32 %v301_v11, %v13_v3  ;;  %v32_v18 = vmul.f32 %v301_v11, %v11_v7  ;;  %v35_v19 = vmul.f32 %v301_v11, %v14_v8  ;;  %v33_v20 = vmul.f32 %v301_v11, %v12_v9  ;;  %v25_v7 = vld [vmem:[%s517_s0 + $0x70] sm:$0xff] }
   0x9   :  { %v37_v21 = vmul.f32 %v301_v11, %v16_v10  ;;  %v36_v22 = vmul.f32 %v301_v11, %v15_v12  ;;  %v39_v23 = vmul.f32 %v301_v11, %v18_v13  ;;  %v38_v24 = vmul.f32 %v301_v11, %v17_v14 }
   0xa   :  { %v50_v25 = vmax.f32 %v34_v17, 0.0  ;;  %v48_v26 = vmax.f32 %v32_v18, 0.0  ;;  %v51_v27 = vmax.f32 %v35_v19, 0.0  ;;  %v49_v28 = vmax.f32 %v33_v20, 0.0 }
   0xb   :  { %v53_v29 = vmax.f32 %v37_v21, 0.0  ;;  %v52_v30 = vmax.f32 %v36_v22, 0.0  ;;  %v55_v31 = vmax.f32 %v39_v23, 0.0  ;;  %v54_v32 = vmax.f32 %v38_v24, 0.0 }
   0xc   :  { %v70_v33 = vmul.f32 %v312_v15, %v50_v25  ;;  %v68_v34 = vmul.f32 %v312_v15, %v48_v26  ;;  %v71_v35 = vmul.f32 %v312_v15, %v51_v27  ;;  %v69_v36 = vmul.f32 %v312_v15, %v49_v28 }
   0xd   :  { %v73_v37 = vmul.f32 %v312_v15, %v53_v29  ;;  %v72_v38 = vmul.f32 %v312_v15, %v52_v30  ;;  %v75_v39 = vmul.f32 %v312_v15, %v55_v31  ;;  %v74_v40 = vmul.f32 %v312_v15, %v54_v32 }
   0xe   :  { %v86_v41 = vmax.f32 %v70_v33, 0.0  ;;  %v84_v42 = vmax.f32 %v68_v34, 0.0  ;;  %v87_v43 = vmax.f32 %v71_v35, 0.0  ;;  %v85_v44 = vmax.f32 %v69_v36, 0.0 }
   0xf   :  { %v89_v45 = vmax.f32 %v73_v37, 0.0  ;;  %v88_v46 = vmax.f32 %v72_v38, 0.0  ;;  %v91_v47 = vmax.f32 %v75_v39, 0.0  ;;  %v90_v48 = vmax.f32 %v74_v40, 0.0 }
  0x10   :  { %v333_v49 = vmul.f32 %v314_v16, %v86_v41  ;;  %v336_v50 = vmul.f32 %v314_v16, %v84_v42  ;;  %v339_v51 = vmul.f32 %v314_v16, %v87_v43  ;;  %v342_v52 = vmul.f32 %v314_v16, %v85_v44 }
  0x11   :  { %v345_v53 = vmul.f32 %v314_v16, %v89_v45  ;;  %v361_v59 = vmul.f32 %v314_v16, %v88_v46  ;;  %v377_v1 = vmul.f32 %v314_v16, %v91_v47  ;;  %v380_v2 = vmul.f32 %v314_v16, %v90_v48 }
  0x12   :  { %v122_v57 = vmul.f32 %v333_v49, %v333_v49  ;;  %v120_v58 = vmul.f32 %v336_v50, %v336_v50  ;;  %v123_v63 = vmul.f32 %v339_v51, %v339_v51  ;;  %v121_v0 = vmul.f32 %v342_v52, %v342_v52 }
  0x13   :  { %v41_v3 = vmul.f32 %v301_v11, %v20_v54  ;;  %v40_v4 = vmul.f32 %v301_v11, %v19_v55  ;;  %v43_v5 = vmul.f32 %v301_v11, %v22_v56  ;;  %v125_v8 = vmul.f32 %v345_v53, %v345_v53 }
  0x14   :  { %140 = vadd.xlane.f32.xlu1 %v122_v57  ;;  %136 = vadd.xlane.f32.xlu0 %v120_v58  ;;  %v42_v9 = vmul.f32 %v301_v11, %v21_v60  ;;  %v45_v10 = vmul.f32 %v301_v11, %v24_v61  ;;  %v44_v12 = vmul.f32 %v301_v11, %v23_v62 }
  0x15   :  { %v124_v13 = vmul.f32 %v361_v59, %v361_v59  ;;  %v57_v14 = vmax.f32 %v41_v3, 0.0  ;;  %v56_v17 = vmax.f32 %v40_v4, 0.0  ;;  %v59_v18 = vmax.f32 %v43_v5, 0.0 }
  0x16   :  { %v58_v19 = vmax.f32 %v42_v9, 0.0  ;;  %v61_v20 = vmax.f32 %v45_v10, 0.0  ;;  %v47_v21 = vmul.f32 %v301_v11, %v26_v6  ;;  %v46_v22 = vmul.f32 %v301_v11, %v25_v7 }
  0x17   :  { %v77_v23 = vmul.f32 %v312_v15, %v57_v14  ;;  %v76_v24 = vmul.f32 %v312_v15, %v56_v17  ;;  %v79_v25 = vmul.f32 %v312_v15, %v59_v18  ;;  %v60_v26 = vmax.f32 %v44_v12, 0.0 }
  0x18   :  { %142 = vadd.xlane.f32.xlu1 %v123_v63  ;;  %138 = vadd.xlane.f32.xlu0 %v121_v0  ;;  %v78_v27 = vmul.f32 %v312_v15, %v58_v19  ;;  %v127_v28 = vmul.f32 %v377_v1, %v377_v1  ;;  %v126_v29 = vmul.f32 %v380_v2, %v380_v2  ;;  %v63_v33 = vmax.f32 %v47_v21, 0.0 }
  0x19   :  { %v93_v30 = vmax.f32 %v77_v23, 0.0  ;;  %v92_v31 = vmax.f32 %v76_v24, 0.0  ;;  %v95_v11 = vmax.f32 %v79_v25, 0.0  ;;  %v81_v32 = vmul.f32 %v312_v15, %v61_v20 }
  0x1a   :  { %v62_v34 = vmax.f32 %v46_v22, 0.0  ;;  %v94_v37 = vmax.f32 %v78_v27, 0.0  ;;  %v80_v38 = vmul.f32 %v312_v15, %v60_v26  ;;  %v83_v41 = vmul.f32 %v312_v15, %v63_v33 }
  0x1b   :  { %v410_v35 = vmul.f32 %v314_v16, %v93_v30  ;;  %v413_v36 = vmul.f32 %v314_v16, %v92_v31  ;;  %v417_v39 = vmul.f32 %v314_v16, %v95_v11  ;;  %v97_v40 = vmax.f32 %v81_v32, 0.0 }
  0x1c   :  { %146 = vadd.xlane.f32.xlu1 %v125_v8  ;;  %144 = vadd.xlane.f32.xlu0 %v124_v13  ;;  %v82_v42 = vmul.f32 %v312_v15, %v62_v34  ;;  %v426_v45 = vmul.f32 %v314_v16, %v94_v37  ;;  %v96_v46 = vmax.f32 %v80_v38, 0.0  ;;  %v99_v48 = vmax.f32 %v83_v41, 0.0 }
  0x1d   :  { %v129_v43 = vmul.f32 %v410_v35, %v410_v35  ;;  %v128_v44 = vmul.f32 %v413_v36, %v413_v36  ;;  %v429_v47 = vmul.f32 %v314_v16, %v97_v40  ;;  %v131_v15 = vmul.f32 %v417_v39, %v417_v39 }
  0x1e   :  { %v130_v54 = vmul.f32 %v426_v45, %v426_v45  ;;  %v436_v55 = vmul.f32 %v314_v16, %v96_v46  ;;  %v98_v56 = vmax.f32 %v82_v42, 0.0  ;;  %v439_v57 = vmul.f32 %v314_v16, %v99_v48 }
  0x1f   :  { %v133_v58 = vmul.f32 %v429_v47, %v429_v47 }
  0x20   :  { %150 = vadd.xlane.f32.xlu1 %v127_v28  ;;  %148 = vadd.xlane.f32.xlu0 %v126_v29  ;;  %v132_v60 = vmul.f32 %v436_v55, %v436_v55  ;;  %v446_v61 = vmul.f32 %v314_v16, %v98_v56  ;;  %v135_v62 = vmul.f32 %v439_v57, %v439_v57 }
  0x22   :  { %v134_v63 = vmul.f32 %v446_v61, %v446_v61 }
  0x24   :  { %154 = vadd.xlane.f32.xlu1 %v129_v43  ;;  %152 = vadd.xlane.f32.xlu0 %v128_v44 }
  0x28   :  { %158 = vadd.xlane.f32.xlu1 %v131_v15  ;;  %156 = vadd.xlane.f32.xlu0 %v130_v54 }
  0x2c   :  { %162 = vadd.xlane.f32.xlu1 %v133_v58  ;;  %160 = vadd.xlane.f32.xlu0 %v132_v60 }
  0x30   :  { %166 = vadd.xlane.f32.xlu1 %v135_v62  ;;  %164 = vadd.xlane.f32.xlu0 %v134_v63 }
  0x9d   :  { %v141_v0 = vpop.xlane.xlu1 %140  ;;  %v137_v3 = vpop.xlane.xlu0 %136 }
  0x9e   :  { %v170_v4 = vmax.f32 %v141_v0, 1e-24  ;;  %v168_v5 = vmax.f32 %v137_v3, 1e-24 }
  0xa0   :  { %236 = vrsqrt.f32 %v170_v4 }
  0xa1   :  { %238 = vrsqrt.f32 %v168_v5  ;;  %v143_v6 = vpop.xlane.xlu1 %142  ;;  %v139_v7 = vpop.xlane.xlu0 %138 }
  0xa2   :  { %v171_v16 = vmax.f32 %v143_v6, 1e-24  ;;  %v169_v8 = vmax.f32 %v139_v7, 1e-24 }
  0xa4   :  { %240 = vrsqrt.f32 %v171_v16 }
  0xa5   :  { %242 = vrsqrt.f32 %v169_v8  ;;  %v147_v9 = vpop.xlane.xlu1 %146  ;;  %v145_v10 = vpop.xlane.xlu0 %144 }
  0xa6   :  { %v173_v12 = vmax.f32 %v147_v9, 1e-24  ;;  %v172_v13 = vmax.f32 %v145_v10, 1e-24 }
  0xa8   :  { %244 = vrsqrt.f32 %v173_v12 }
  0xa9   :  { %246 = vrsqrt.f32 %v172_v13  ;;  %v151_v14 = vpop.xlane.xlu1 %150  ;;  %v149_v17 = vpop.xlane.xlu0 %148 }
  0xaa   :  { %v175_v18 = vmax.f32 %v151_v14, 1e-24  ;;  %v174_v19 = vmax.f32 %v149_v17, 1e-24 }
  0xac   :  { %248 = vrsqrt.f32 %v175_v18 }
  0xad   :  { %v237_v20 = vpop.eup %236  ;;  %250 = vrsqrt.f32 %v174_v19  ;;  %v155_v21 = vpop.xlane.xlu1 %154 }
  0xae   :  { %v153_v22 = vpop.xlane.xlu0 %152  ;;  %v239_v23 = vpop.eup %238  ;;  %v202_v24 = vmul.f32 %v237_v20, %v333_v49  ;;  %v177_v25 = vmax.f32 %v155_v21, 1e-24 }
  0xaf   :  { %v176_v26 = vmax.f32 %v153_v22, 1e-24  ;;  %v200_v27 = vmul.f32 %v239_v23, %v336_v50 }
  0xb0   :  { %218 = vst [vmem:[%s518_s2 + $0x10] sm:$0xff] %v202_v24  ;;  %252 = vrsqrt.f32 %v177_v25 }
  0xb1   :  { %v241_v28 = vpop.eup %240  ;;  %216 = vst [vmem:[%s518_s2] sm:$0xff] %v200_v27  ;;  %254 = vrsqrt.f32 %v176_v26  ;;  %v159_v29 = vpop.xlane.xlu1 %158 }
  0xb2   :  { %v157_v30 = vpop.xlane.xlu0 %156  ;;  %v243_v31 = vpop.eup %242  ;;  %v203_v49 = vmul.f32 %v241_v28, %v339_v51  ;;  %v179_v11 = vmax.f32 %v159_v29, 1e-24 }
  0xb3   :  { %v178_v32 = vmax.f32 %v157_v30, 1e-24  ;;  %v201_v50 = vmul.f32 %v243_v31, %v342_v52 }
  0xb4   :  { %219 = vst [vmem:[%s518_s2 + $0x18] sm:$0xff] %v203_v49  ;;  %256 = vrsqrt.f32 %v179_v11 }
  0xb5   :  { %v245_v33 = vpop.eup %244  ;;  %217 = vst [vmem:[%s518_s2 + $0x8] sm:$0xff] %v201_v50  ;;  %258 = vrsqrt.f32 %v178_v32  ;;  %v163_v34 = vpop.xlane.xlu1 %162 }
  0xb6   :  { %v161_v37 = vpop.xlane.xlu0 %160  ;;  %v247_v38 = vpop.eup %246  ;;  %v205_v51 = vmul.f32 %v245_v33, %v345_v53  ;;  %v181_v40 = vmax.f32 %v163_v34, 1e-24 }
  0xb7   :  { %v180_v41 = vmax.f32 %v161_v37, 1e-24  ;;  %v204_v52 = vmul.f32 %v247_v38, %v361_v59 }
  0xb8   :  { %221 = vst [vmem:[%s518_s2 + $0x28] sm:$0xff] %v205_v51  ;;  %260 = vrsqrt.f32 %v181_v40 }
  0xb9   :  { %v249_v42 = vpop.eup %248  ;;  %220 = vst [vmem:[%s518_s2 + $0x20] sm:$0xff] %v204_v52  ;;  %262 = vrsqrt.f32 %v180_v41  ;;  %v167_v43 = vpop.xlane.xlu1 %166 }
  0xba   :  { %v165_v44 = vpop.xlane.xlu0 %164  ;;  %v251_v46 = vpop.eup %250  ;;  %v207_v53 = vmul.f32 %v249_v42, %v377_v1  ;;  %v183_v48 = vmax.f32 %v167_v43, 1e-24 }
  0xbb   :  { %v182_v15 = vmax.f32 %v165_v44, 1e-24  ;;  %v206_v59 = vmul.f32 %v251_v46, %v380_v2 }
  0xbc   :  { %223 = vst [vmem:[%s518_s2 + $0x38] sm:$0xff] %v207_v53  ;;  %264 = vrsqrt.f32 %v183_v48 }
  0xbd   :  { %v253_v54 = vpop.eup %252  ;;  %222 = vst [vmem:[%s518_s2 + $0x30] sm:$0xff] %v206_v59  ;;  %266 = vrsqrt.f32 %v182_v15 }
  0xbe   :  { %v255_v56 = vpop.eup %254  ;;  %v209_v58 = vmul.f32 %v253_v54, %v410_v35 }
  0xbf   :  { %v208_v1 = vmul.f32 %v255_v56, %v413_v36 }
  0xc0   :  { %225 = vst [vmem:[%s518_s2 + $0x48] sm:$0xff] %v209_v58 }
  0xc1   :  { %v257_v2 = vpop.eup %256  ;;  %224 = vst [vmem:[%s518_s2 + $0x40] sm:$0xff] %v208_v1 }
  0xc2   :  { %v259_v60 = vpop.eup %258  ;;  %v211_v62 = vmul.f32 %v257_v2, %v417_v39 }
  0xc3   :  { %v210_v63 = vmul.f32 %v259_v60, %v426_v45 }
  0xc4   :  { %227 = vst [vmem:[%s518_s2 + $0x58] sm:$0xff] %v211_v62 }
  0xc5   :  { %v261_v35 = vpop.eup %260  ;;  %226 = vst [vmem:[%s518_s2 + $0x50] sm:$0xff] %v210_v63 }
  0xc6   :  { %v263_v36 = vpop.eup %262  ;;  %v213_v0 = vmul.f32 %v261_v35, %v429_v47 }
  0xc7   :  { %v212_v3 = vmul.f32 %v263_v36, %v436_v55 }
  0xc8   :  { %229 = vst [vmem:[%s518_s2 + $0x68] sm:$0xff] %v213_v0 }
  0xc9   :  { %v265_v39 = vpop.eup %264  ;;  %228 = vst [vmem:[%s518_s2 + $0x60] sm:$0xff] %v212_v3 }
  0xca   :  { %v267_v45 = vpop.eup %266  ;;  %v215_v4 = vmul.f32 %v265_v39, %v439_v57 }
  0xcb   :  { %v214_v5 = vmul.f32 %v267_v45, %v446_v61 }
  0xcc   :  { %231 = vst [vmem:[%s518_s2 + $0x78] sm:$0xff] %v215_v4 }
  0xcd   :  { %230 = vst [vmem:[%s518_s2 + $0x70] sm:$0xff] %v214_v5 }

</bundles_post_ra>
